<compile_context>
chip_gen: v6e
topology: v6e:2x2x1
jax: 0.10.0
libtpu: 0.0.40
codegen_flags: <defaults>
</compile_context>

<pallas_src>
import jax
import jax.numpy as jnp
from jax.experimental import pallas as pl
from jax.experimental.pallas import tpu as pltpu

_N_HALVES = 2          # leading 'parallel' grid axis (uses both TCs on v7x)
_MAX_BLOCK_ROWS = 256  # with LANE=4096 -> 4 MiB f32 / block (v7x-safe double buffering)


def _round_up(v, m):
    return ((v + m - 1) // m) * m


def _minmax_kernel(x_ref, min_out_ref, max_out_ref, min_acc, max_acc):
    """Fused global min/max over a (rows, LANE) slab.

    grid = (_N_HALVES, n_steps): axis 0 is 'parallel' (megacore split on v7x),
    axis 1 is the 'arbitrary' reduction axis with resident accumulators.
    """
    step = pl.program_id(1)

    @pl.when(step == 0)
    def _init():
        min_acc[...] = jnp.full(min_acc.shape, jnp.inf, dtype=min_acc.dtype)
        max_acc[...] = jnp.full(max_acc.shape, -jnp.inf, dtype=max_acc.dtype)

    br, lane = x_ref.shape
    blk = x_ref[...].reshape(br // 8, 8, lane)  # vreg-group view; no data movement
    # Reducing over the leading axis is element-wise across vregs (pure VPU):
    # the steady-state loop stays DMA/vld-bound with zero XLU work.
    min_acc[...] = jnp.minimum(min_acc[...], jnp.min(blk, axis=0))
    max_acc[...] = jnp.maximum(max_acc[...], jnp.max(blk, axis=0))

    @pl.when(step == pl.num_programs(1) - 1)
    def _finalize():
        # One cross-lane/sublane (XLU) reduce per half, only at the very end.
        gmin = jnp.min(min_acc[...])
        gmax = jnp.max(max_acc[...])
        min_out_ref[...] = jnp.full(min_out_ref.shape, gmin, dtype=min_out_ref.dtype)
        max_out_ref[...] = jnp.full(max_out_ref.shape, gmax, dtype=max_out_ref.dtype)


def _slab_params(total):
    """Pick (lane, block_rows, padded_rows) for a lane-dense f32 slab."""
    lane = 128
    for cand in (4096, 2048, 1024, 512, 256):
        if total >= cand * 8 * _N_HALVES:
            lane = cand
            break
    rows = pl.cdiv(total, lane)
    block_rows = min(_MAX_BLOCK_ROWS,
                     max(8, _round_up(pl.cdiv(rows, _N_HALVES), 8)))
    padded_rows = _round_up(rows, _N_HALVES * block_rows)
    return lane, block_rows, padded_rows


@jax.jit
def _global_min_max(x):
    """Single fused HBM pass computing (min(x), max(x)) via Pallas."""
    total = x.size
    lane, block_rows, padded_rows = _slab_params(total)

    flat = x.reshape(-1).astype(jnp.float32)
    pad = padded_rows * lane - total
    if pad:
        # Edge-pad with a real element of x so padding never perturbs min/max.
        flat = jnp.pad(flat, (0, pad), mode="edge")
    slab = flat.reshape(padded_rows, lane)

    n_steps = padded_rows // (block_rows * _N_HALVES)

    grid_spec = pltpu.PrefetchScalarGridSpec(
        num_scalar_prefetch=0,
        grid=(_N_HALVES, n_steps),
        in_specs=[
            pl.BlockSpec((block_rows, lane), lambda p, i: (p * n_steps + i, 0)),
        ],
        out_specs=[
            pl.BlockSpec((1, 8, 128), lambda p, i: (p, 0, 0)),
            pl.BlockSpec((1, 8, 128), lambda p, i: (p, 0, 0)),
        ],
        scratch_shapes=[
            pltpu.VMEM((8, lane), jnp.float32),
            pltpu.VMEM((8, lane), jnp.float32),
        ],
    )

    min_half, max_half = pl.pallas_call(
        _minmax_kernel,
        out_shape=(
            jax.ShapeDtypeStruct((_N_HALVES, 8, 128), jnp.float32),
            jax.ShapeDtypeStruct((_N_HALVES, 8, 128), jnp.float32),
        ),
        grid_spec=grid_spec,
        compiler_params=pltpu.CompilerParams(
            dimension_semantics=("parallel", "arbitrary"),
            vmem_limit_bytes=32 * 1024 * 1024,
        ),
    )(slab)

    gmin = jnp.min(min_half[:, 0, 0])
    gmax = jnp.max(max_half[:, 0, 0])
    return gmin, gmax


def cached_detectron2_preprocess(x):
    """Pallas equivalent of CachedDetectron2Preprocessor.forward's tensor work.

    Returns (x, gmin, gmax): x is passed through untouched (the module never
    modifies it, so there is no kernel writeback of x), plus the global
    min/max used for the 0 <= min <= max <= 1 validation.
    """
    assert x.ndim == 4, "expected 4-D NHWC input"
    assert x.shape[3] == 3, "expected 3 channels in the last axis"
    gmin, gmax = _global_min_max(x)
    # TODO(synk): loading cached Detectron2 `Instances` from the .npz cache and
    # constructing the Instances objects is pure file I/O / Python object work
    # with no Pallas equivalent.
    return x, gmin, gmax


if __name__ == "__main__":
    key = jax.random.PRNGKey(0)
    # NHWC with 3 channels, values in [0, 1), matching the module's contract.
    x = jax.random.uniform(key, (2, 16, 16, 3), dtype=jnp.float32)

    x_out, gmin, gmax = cached_detectron2_preprocess(x)
    jax.block_until_ready((x_out, gmin, gmax))

    # The module's `assert 0.0 <= x.min() <= x.max() <= 1.0`.
    gmin_f, gmax_f = float(gmin), float(gmax)
    assert 0.0 <= gmin_f <= gmax_f <= 1.0, (gmin_f, gmax_f)

    # Cross-check the kernel's reduction against plain JAX.
    ref_min, ref_max = float(jnp.min(x)), float(jnp.max(x))
    assert abs(gmin_f - ref_min) < 1e-6, (gmin_f, ref_min)
    assert abs(gmax_f - ref_max) < 1e-6, (gmax_f, ref_max)

    # x passes through untouched: no identity writeback through the kernel.
    assert x_out is x

    print("KERNEL_OK")
</pallas_src>

<mosaic_0001>
module attributes {stable_mosaic.version = 11 : i64} {
  func.func @_minmax_kernel(%arg0: i32, %arg1: i32, %arg2: memref<8x128xf32, #tpu.memory_space<vmem>>, %arg3: memref<1x8x128xf32, #tpu.memory_space<vmem>>, %arg4: memref<1x8x128xf32, #tpu.memory_space<vmem>>, %arg5: memref<8x128xf32, #tpu.memory_space<vmem>>, %arg6: memref<8x128xf32, #tpu.memory_space<vmem>>) attributes {dimension_semantics = [#tpu.dimension_semantics<parallel>, #tpu.dimension_semantics<arbitrary>], iteration_bounds = array<i64: 2, 1>, scalar_prefetch = 0 : i64, scratch_operands = 2 : i64, tpu.core_type = #tpu.core_type<tc>, window_params = [{transform_indices = @transform_0, window_bounds = array<i64: 8, 128>}, {transform_indices = @transform_1, window_bounds = array<i64: 1, 8, 128>}, {transform_indices = @transform_2, window_bounds = array<i64: 1, 8, 128>}]} {
    %c0_i32 = arith.constant 0 : i32
    %0 = arith.cmpi eq, %arg1, %c0_i32 : i32
    %1 = arith.extui %0 : i1 to i32
    %c0_i32_0 = arith.constant 0 : i32
    %2 = arith.cmpi ne, %1, %c0_i32_0 : i32
    scf.if %2 {
      %cst_13 = arith.constant 0x7F800000 : f32
      %16 = vector.broadcast %cst_13 : f32 to vector<8x128xf32>
      %c0_14 = arith.constant 0 : index
      %c0_15 = arith.constant 0 : index
      %17 = vector.load %arg5[%c0_14, %c0_15] : memref<8x128xf32, #tpu.memory_space<vmem>>, vector<8x128xf32>
      tpu.vector_store %arg5[%c0_14, %c0_15], %16 {strides = array<i32>} : memref<8x128xf32, #tpu.memory_space<vmem>>, vector<8x128xf32>,
      %cst_16 = arith.constant 0xFF800000 : f32
      %18 = vector.broadcast %cst_16 : f32 to vector<8x128xf32>
      %c0_17 = arith.constant 0 : index
      %c0_18 = arith.constant 0 : index
      %19 = vector.load %arg6[%c0_17, %c0_18] : memref<8x128xf32, #tpu.memory_space<vmem>>, vector<8x128xf32>
      tpu.vector_store %arg6[%c0_17, %c0_18], %18 {strides = array<i32>} : memref<8x128xf32, #tpu.memory_space<vmem>>, vector<8x128xf32>,
    } else {
    }
    %c0 = arith.constant 0 : index
    %c0_1 = arith.constant 0 : index
    %3 = vector.load %arg2[%c0, %c0_1] : memref<8x128xf32, #tpu.memory_space<vmem>>, vector<8x128xf32>
    %4 = vector.shape_cast %3 : vector<8x128xf32> to vector<1x8x128xf32>
    %c0_2 = arith.constant 0 : index
    %c0_3 = arith.constant 0 : index
    %5 = vector.load %arg5[%c0_2, %c0_3] : memref<8x128xf32, #tpu.memory_space<vmem>>, vector<8x128xf32>
    %cst = arith.constant dense<0x7F800000> : vector<8x128xf32>
    %6 = vector.multi_reduction <minimumf>, %4, %cst [0] : vector<1x8x128xf32> to vector<8x128xf32>
    %7 = arith.minimumf %5, %6 : vector<8x128xf32>
    %c0_4 = arith.constant 0 : index
    %c0_5 = arith.constant 0 : index
    %8 = vector.load %arg5[%c0_4, %c0_5] : memref<8x128xf32, #tpu.memory_space<vmem>>, vector<8x128xf32>
    tpu.vector_store %arg5[%c0_4, %c0_5], %7 {strides = array<i32>} : memref<8x128xf32, #tpu.memory_space<vmem>>, vector<8x128xf32>,
    %c0_6 = arith.constant 0 : index
    %c0_7 = arith.constant 0 : index
    %9 = vector.load %arg6[%c0_6, %c0_7] : memref<8x128xf32, #tpu.memory_space<vmem>>, vector<8x128xf32>
    %cst_8 = arith.constant dense<0xFF800000> : vector<8x128xf32>
    %10 = vector.multi_reduction <maximumf>, %4, %cst_8 [0] : vector<1x8x128xf32> to vector<8x128xf32>
    %11 = arith.maximumf %9, %10 : vector<8x128xf32>
    %c0_9 = arith.constant 0 : index
    %c0_10 = arith.constant 0 : index
    %12 = vector.load %arg6[%c0_9, %c0_10] : memref<8x128xf32, #tpu.memory_space<vmem>>, vector<8x128xf32>
    tpu.vector_store %arg6[%c0_9, %c0_10], %11 {strides = array<i32>} : memref<8x128xf32, #tpu.memory_space<vmem>>, vector<8x128xf32>,
    %c0_i32_11 = arith.constant 0 : i32
    %13 = arith.cmpi eq, %arg1, %c0_i32_11 : i32
    %14 = arith.extui %13 : i1 to i32
    %c0_i32_12 = arith.constant 0 : i32
    %15 = arith.cmpi ne, %14, %c0_i32_12 : i32
    scf.if %15 {
      %c0_13 = arith.constant 0 : index
      %c0_14 = arith.constant 0 : index
      %16 = vector.load %arg5[%c0_13, %c0_14] : memref<8x128xf32, #tpu.memory_space<vmem>>, vector<8x128xf32>
      %17 = vector.shape_cast %16 : vector<8x128xf32> to vector<1x8x128xf32>
      %cst_15 = arith.constant dense<0x7F800000> : vector<1xf32>
      %18 = vector.multi_reduction <minimumf>, %17, %cst_15 [1, 2] : vector<1x8x128xf32> to vector<1xf32>
      %19 = vector.shape_cast %18 : vector<1xf32> to vector<1x1x1xf32>
      %20 = vector.extract %19[0, 0, 0] : f32 from vector<1x1x1xf32>
      %c0_16 = arith.constant 0 : index
      %c0_17 = arith.constant 0 : index
      %21 = vector.load %arg6[%c0_16, %c0_17] : memref<8x128xf32, #tpu.memory_space<vmem>>, vector<8x128xf32>
      %22 = vector.shape_cast %21 : vector<8x128xf32> to vector<1x8x128xf32>
      %cst_18 = arith.constant dense<0xFF800000> : vector<1xf32>
      %23 = vector.multi_reduction <maximumf>, %22, %cst_18 [1, 2] : vector<1x8x128xf32> to vector<1xf32>
      %24 = vector.shape_cast %23 : vector<1xf32> to vector<1x1x1xf32>
      %25 = vector.extract %24[0, 0, 0] : f32 from vector<1x1x1xf32>
      %26 = vector.broadcast %20 : f32 to vector<1x8x128xf32>
      %c0_19 = arith.constant 0 : index
      %c0_20 = arith.constant 0 : index
      %c0_21 = arith.constant 0 : index
      %27 = vector.load %arg3[%c0_19, %c0_20, %c0_21] : memref<1x8x128xf32, #tpu.memory_space<vmem>>, vector<1x8x128xf32>
      tpu.vector_store %arg3[%c0_19, %c0_20, %c0_21], %26 {strides = array<i32>} : memref<1x8x128xf32, #tpu.memory_space<vmem>>, vector<1x8x128xf32>,
      %28 = vector.broadcast %25 : f32 to vector<1x8x128xf32>
      %c0_22 = arith.constant 0 : index
      %c0_23 = arith.constant 0 : index
      %c0_24 = arith.constant 0 : index
      %29 = vector.load %arg4[%c0_22, %c0_23, %c0_24] : memref<1x8x128xf32, #tpu.memory_space<vmem>>, vector<1x8x128xf32>
      tpu.vector_store %arg4[%c0_22, %c0_23, %c0_24], %28 {strides = array<i32>} : memref<1x8x128xf32, #tpu.memory_space<vmem>>, vector<1x8x128xf32>,
    } else {
    }
    return
  }
  func.func @transform_0(%arg0: i32, %arg1: i32) -> (i32, i32) {
    %c1_i32 = arith.constant 1 : i32
    %0 = arith.muli %arg0, %c1_i32 : i32
    %1 = arith.addi %0, %arg1 : i32
    %c0_i32 = arith.constant 0 : i32
    %c0_i32_0 = arith.constant 0 : i32
    return %1, %c0_i32 : i32, i32
  }
  func.func @transform_1(%arg0: i32, %arg1: i32) -> (i32, i32, i32) {
    %c0_i32 = arith.constant 0 : i32
    %c0_i32_0 = arith.constant 0 : i32
    %c0_i32_1 = arith.constant 0 : i32
    return %arg0, %c0_i32, %c0_i32_0 : i32, i32, i32
  }
  func.func @transform_2(%arg0: i32, %arg1: i32) -> (i32, i32, i32) {
    %c0_i32 = arith.constant 0 : i32
    %c0_i32_0 = arith.constant 0 : i32
    %c0_i32_1 = arith.constant 0 : i32
    return %arg0, %c0_i32, %c0_i32_0 : i32, i32, i32
  }
}

</mosaic_0001>

<bundles_post_ra>
// kernel: _global_min_max.1
= control target key start
LH: loop header
LB: loop body
LE: loop exit
PB: predicated region body
PF: predicated region fallthrough
CT: control target
= control target key end

     0   :  { %s378_s9 = smov 0   ;;  %s380_s10 = smov 0   ;;  %s414_s0 = inlined_call_operand.vmem [shape: f32[16,128], index: 0, kind: input, shape index: {}]   ;;  %s415_s1 = inlined_call_operand.vmem [shape: f32[2,8,128], index: 1, kind: output, shape index: {0}]   ;;  %s416_s2 = inlined_call_operand.vmem [shape: f32[2,8,128], index: 2, kind: output, shape index: {1}]  }
   0x1   :  { %s382_s11 = smov 0  }
   0x2 LB: > { %s25_s12 = sadd.s32 1, %s357_s10  ;;  %p305_p0 = scmp.ge.s32.totalorder %s361_s11, 1  ;;  %s361_s11 = sphi %s382_s11, %s13_s11   ;;  %s357_s10 = sphi %s380_s10, %s418_s10   ;;  %s353_s9 = sphi %s378_s9, %s417_s9  }
   0x3   : > { %p27_p1 = scmp.ge.s32.totalorder %s25_s12, 2  ;;  %p130_p2 = scmp.lt.s32.totalorder %s361_s11, 3 }
   0x5   : > { %s420_s12 = smov (%p27_p1, %s25_s12), 0  ;;  %p131_p3 = pnand %p305_p0, %p130_p2 }
   0x6   : > { %p156_p4 = scmp.lt.s32.totalorder (!%p131_p3), %s353_s9, 1 }
   0x7   : > { %134 = sbr.rel (%p131_p3) target bundleno = 222 (0xde), region = 24 }
   0xc   : > { %s422_s9 = smov (!%p156_p4, %s353_s9), 1 }
   0xd   : > { %s306_s13 = sshll.u32 %s422_s9, 3 }
   0xe   : > { %s159_s16 = scalar_lea.vmem %s414_s0, %s306_s13  ;;  %s164_s19 = scalar_lea.vmem %s415_s1, %s306_s13 }
   0xf   : > { %v175_v0 = vld [vmem:[%s159_s16] sm:$0xff]  ;;  %s168_s23 = scalar_lea.vmem %s416_s2, %s306_s13 }
  0x10   : > { %186 = vmin.xlane.f32.xlu0 %v175_v0 }
  0x14   : > { %196 = vmax.xlane.f32.xlu0 %v175_v0 }
  0x99   : > { %v187_v1 = vpop.xlane.xlu0 %186 }
  0x9a   : > { %v188_v2 = vrot.slane %v187_v1, 4 }
  0x9c   : > { %v189_v3 = vmin.f32 %v187_v1, %v188_v2 }
  0x9d   : > { %v197_v4 = vpop.xlane.xlu0 %196 }
  0x9e   : > { %v190_v5 = vrot.slane %v189_v3, 2  ;;  %v198_v6 = vrot.slane %v197_v4, 4 }
  0xa0   : > { %v199_v7 = vmax.f32 %v197_v4, %v198_v6  ;;  %v191_v8 = vmin.f32 %v189_v3, %v190_v5 }
  0xa2   : > { %v200_v9 = vrot.slane %v199_v7, 2  ;;  %v192_v10 = vrot.slane %v191_v8, 1 }
  0xa4   : > { %v201_v11 = vmax.f32 %v199_v7, %v200_v9  ;;  %v193_v12 = vmin.f32 %v191_v8, %v192_v10 }
  0xa6   : > { %311 = vpush %v193_v12  ;;  %v202_v13 = vrot.slane %v201_v11, 1 }
  0xa8   : > { %v203_v14 = vmax.f32 %v201_v11, %v202_v13 }
  0xaa   : > { %313 = vpush %v203_v14 }
  0xd7   : > { %s312_s20 = spop %311 }
  0xd8   : > { %v205_v15 = vstv %s312_s20 }
  0xd9   : > { %206 = vst [vmem:[%s164_s19] sm:$0xff] %v205_v15 }
  0xdb   : > { %s314_s24 = spop %313 }
  0xdc   : > { %v207_v16 = vstv %s314_s24 }
  0xdd   : > { %208 = vst [vmem:[%s168_s23] sm:$0xff] %v207_v16 }
  0xde PF: > { %s13_s11 = sadd.s32 1, %s361_s11   ;;  %s417_s9 = smov %s357_s10 }
  0xdf   : > { %p10_p5 = scmp.ge.s32.totalorder %s13_s11, 4   ;;  %s418_s10 = smov %s420_s12 }
  0xe1   :  { %12 = sbr.rel (!%p10_p5) target bundleno = 2 (0x2), region = 74 }

</bundles_post_ra>
